<compile_context>
chip_gen: v7x
topology: tpu7x:2x2x1
jax: 0.10.0
libtpu: 0.0.40
codegen_flags: <defaults>
</compile_context>

<pallas_src>
import functools

import jax
import jax.numpy as jnp
from jax.experimental import pallas as pl
from jax.experimental.pallas import tpu as pltpu

LANE = 128


def _stack_pool_kernel(x_ref, o_ref, *, pooling_type):
    """x_ref: (S, TR, LANE) input block; o_ref: (S_out, TR, LANE) output block.

    Reduce over the small, static leading stack axis with an unrolled
    elementwise loop (VPU only), then write the pooled tile to every output
    stack slice with full-width unmasked stores.
    """
    s_in = x_ref.shape[0]
    if pooling_type == "avg":
        acc = x_ref[0].astype(jnp.float32)
        for s in range(1, s_in):
            acc = acc + x_ref[s].astype(jnp.float32)
        acc = (acc * (1.0 / s_in)).astype(o_ref.dtype)
    elif pooling_type == "max":
        acc = x_ref[0]
        for s in range(1, s_in):
            acc = jnp.maximum(acc, x_ref[s])
        acc = acc.astype(o_ref.dtype)
    else:
        raise NotImplementedError(f"Pooling type {pooling_type} not implemented")

    for s in range(o_ref.shape[0]):
        o_ref[s] = acc


def stack_feature_pooling(
    feat_stack,
    pooling_type="avg",
    *,
    expand_in_kernel=True,
    vmem_block_budget_bytes=12 * 1024 * 1024,
):
    """feat_stack: (S, C, H, W) -> (S, C, H, W); every slice = pool over dim 0."""
    S = feat_stack.shape[0]
    trailing = feat_stack.shape[1:]
    M = 1
    for d in trailing:
        M *= d
    itemsize = jnp.dtype(feat_stack.dtype).itemsize
    s_out = S if expand_in_kernel else 1

    # Lane-dense view: (S, R, 128). R is the sublane-tiled axis.
    R = pl.cdiv(M, LANE)

    # Rows-per-block from a byte budget: double-buffered input + output blocks
    # ~= 2 * (S + s_out) * tr * LANE * itemsize bytes of VMEM.
    denom = 2 * (S + s_out) * LANE * itemsize
    tr = max(8, (vmem_block_budget_bytes // denom) // 8 * 8)
    if tr >= R:
        if R >= 16:
            # Keep at least 2 grid steps so both TensorCores (v7x megacore)
            # issue DMAs.
            tr = min(R, ((pl.cdiv(R, 2) + 7) // 8) * 8)
        else:
            tr = R  # full-extent block (allowed even if not a multiple of 8)

    n_blocks = pl.cdiv(R, tr)
    R_pad = n_blocks * tr
    M_pad = R_pad * LANE

    x2d = feat_stack.reshape(S, M)
    if M_pad != M:
        # Zero-pad the flattened feature axis. Pooling is over the stack axis,
        # so padded columns never mix with real ones; they are sliced off below.
        x2d = jnp.pad(x2d, ((0, 0), (0, M_pad - M)))
    x3d = x2d.reshape(S, R_pad, LANE)

    kernel = functools.partial(_stack_pool_kernel, pooling_type=pooling_type)

    out3d = pl.pallas_call(
        kernel,
        out_shape=jax.ShapeDtypeStruct((s_out, R_pad, LANE), feat_stack.dtype),
        grid_spec=pltpu.PrefetchScalarGridSpec(
            num_scalar_prefetch=0,
            grid=(n_blocks,),
            in_specs=[pl.BlockSpec((S, tr, LANE), lambda j: (0, j, 0))],
            out_specs=pl.BlockSpec((s_out, tr, LANE), lambda j: (0, j, 0)),
        ),
        compiler_params=pltpu.CompilerParams(
            dimension_semantics=("parallel",),
            vmem_limit_bytes=32 * 1024 * 1024,
        ),
    )(x3d)

    out2d = out3d.reshape(s_out, M_pad)[:, :M]
    out = out2d.reshape((s_out,) + tuple(trailing))
    if not expand_in_kernel:
        # Leave the expand to XLA so it can fuse into the consumer.
        out = jnp.broadcast_to(out, feat_stack.shape)
    return out


def _reference(feat_stack, pooling_type="avg"):
    if pooling_type == "avg":
        pooled = jnp.mean(feat_stack, axis=0, keepdims=True)
    else:
        pooled = jnp.max(feat_stack, axis=0, keepdims=True)
    return jnp.broadcast_to(pooled, feat_stack.shape)


if __name__ == "__main__":
    key = jax.random.PRNGKey(0)
    k0, k1 = jax.random.split(key)

    # Stack of 2 NCHW feature maps: (S=2, C=4, H=16, W=16).
    feat_stack = jax.random.normal(k0, (2, 4, 16, 16), dtype=jnp.float32)

    out_avg = jax.block_until_ready(stack_feature_pooling(feat_stack, "avg"))
    ref_avg = _reference(feat_stack, "avg")
    assert out_avg.shape == feat_stack.shape
    assert jnp.allclose(out_avg, ref_avg, atol=1e-5, rtol=1e-5)

    out_max = jax.block_until_ready(stack_feature_pooling(feat_stack, "max"))
    ref_max = _reference(feat_stack, "max")
    assert jnp.allclose(out_max, ref_max, atol=1e-5, rtol=1e-5)

    # Pooled-only kernel output + expand in the wrapper (S x fewer HBM writes).
    out_avg2 = jax.block_until_ready(
        stack_feature_pooling(feat_stack, "avg", expand_in_kernel=False)
    )
    assert jnp.allclose(out_avg2, ref_avg, atol=1e-5, rtol=1e-5)

    # Ragged trailing size (M = 3*10*10 = 300, not a multiple of 128) to
    # exercise the zero-padded lane tail.
    ragged = jax.random.normal(k1, (3, 3, 10, 10), dtype=jnp.float32)
    out_r = jax.block_until_ready(stack_feature_pooling(ragged, "max"))
    assert jnp.allclose(out_r, _reference(ragged, "max"), atol=1e-5, rtol=1e-5)

    print("KERNEL_OK")
</pallas_src>

<mosaic_0001>
module attributes {stable_mosaic.version = 11 : i64} {
  func.func @_stack_pool_kernel(%arg0: i32, %arg1: memref<2x8x128xf32, #tpu.memory_space<vmem>>, %arg2: memref<2x8x128xf32, #tpu.memory_space<vmem>>) attributes {dimension_semantics = [#tpu.dimension_semantics<parallel>], iteration_bounds = array<i64: 1>, scalar_prefetch = 0 : i64, scratch_operands = 0 : i64, tpu.core_type = #tpu.core_type<tc>, window_params = [{transform_indices = @transform_0, window_bounds = array<i64: 2, 8, 128>}, {transform_indices = @transform_1, window_bounds = array<i64: 2, 8, 128>}]} {
    %c0 = arith.constant 0 : index
    %c0_0 = arith.constant 0 : index
    %c0_1 = arith.constant 0 : index
    %0 = vector.load %arg1[%c0, %c0_0, %c0_1] : memref<2x8x128xf32, #tpu.memory_space<vmem>>, vector<1x8x128xf32>
    %1 = vector.shape_cast %0 : vector<1x8x128xf32> to vector<8x128xf32>
    %c1 = arith.constant 1 : index
    %c0_2 = arith.constant 0 : index
    %c0_3 = arith.constant 0 : index
    %2 = vector.load %arg1[%c1, %c0_2, %c0_3] : memref<2x8x128xf32, #tpu.memory_space<vmem>>, vector<1x8x128xf32>
    %3 = vector.shape_cast %2 : vector<1x8x128xf32> to vector<8x128xf32>
    %4 = arith.addf %1, %3 : vector<8x128xf32>
    %cst = arith.constant 5.000000e-01 : f32
    %5 = vector.broadcast %cst : f32 to vector<8x128xf32>
    %6 = arith.mulf %4, %5 : vector<8x128xf32>
    %c0_4 = arith.constant 0 : index
    %c0_5 = arith.constant 0 : index
    %c0_6 = arith.constant 0 : index
    %7 = vector.load %arg2[%c0_4, %c0_5, %c0_6] : memref<2x8x128xf32, #tpu.memory_space<vmem>>, vector<1x8x128xf32>
    %8 = vector.shape_cast %7 : vector<1x8x128xf32> to vector<8x128xf32>
    %9 = vector.shape_cast %6 : vector<8x128xf32> to vector<1x8x128xf32>
    tpu.vector_store %arg2[%c0_4, %c0_5, %c0_6], %9 {strides = array<i32>} : memref<2x8x128xf32, #tpu.memory_space<vmem>>, vector<1x8x128xf32>,
    %c1_7 = arith.constant 1 : index
    %c0_8 = arith.constant 0 : index
    %c0_9 = arith.constant 0 : index
    %10 = vector.load %arg2[%c1_7, %c0_8, %c0_9] : memref<2x8x128xf32, #tpu.memory_space<vmem>>, vector<1x8x128xf32>
    %11 = vector.shape_cast %10 : vector<1x8x128xf32> to vector<8x128xf32>
    %12 = vector.shape_cast %6 : vector<8x128xf32> to vector<1x8x128xf32>
    tpu.vector_store %arg2[%c1_7, %c0_8, %c0_9], %12 {strides = array<i32>} : memref<2x8x128xf32, #tpu.memory_space<vmem>>, vector<1x8x128xf32>,
    return
  }
  func.func @transform_0(%arg0: i32) -> (i32, i32, i32) {
    %c0_i32 = arith.constant 0 : i32
    %c0_i32_0 = arith.constant 0 : i32
    %c0_i32_1 = arith.constant 0 : i32
    return %c0_i32, %arg0, %c0_i32_0 : i32, i32, i32
  }
  func.func @transform_1(%arg0: i32) -> (i32, i32, i32) {
    %c0_i32 = arith.constant 0 : i32
    %c0_i32_0 = arith.constant 0 : i32
    %c0_i32_1 = arith.constant 0 : i32
    return %c0_i32, %arg0, %c0_i32_0 : i32, i32, i32
  }
}

</mosaic_0001>

<bundles_post_ra>
// kernel: tpu_custom_call.1
= control target key start
LH: loop header
LB: loop body
LE: loop exit
PB: predicated region body
PF: predicated region fallthrough
CT: control target
= control target key end

     0   :  { %6 = vsyncpa [#allocation3], 0  ;;  %s138_s0 = inlined_call_operand.hbm [shape: f32[2,8,128], index: 0, kind: input, shape index: {}]   ;;  %s139_s1 = inlined_call_operand.hbm [shape: f32[2,8,128], index: 1, kind: output, shape index: {}]  }
   0x1   :  { %7 = vsyncpa [#allocation4], 0  ;;  %s100_s6 = smov [#allocation2]   ;;  %s52_s10 = scalar_lea.hbm %s138_s0, 256 }
   0x2   :  { %s13_s7 = sshll.u32 %s100_s6, 4  ;;  %p53_p0 = scmp.ne.s32.totalorder %s138_s0, %s52_s10  ;;  %s14_s7 = int_to_ptr.vmem [resolvable:$true] %s13_s7 }
   0x3   :  { %p56_p1 = scmp.lt.u32.totalorder %s52_s10, %s138_s0 }
   0x5   :  { %p58_p2 = pnand %p56_p1, %p53_p0 }
   0x7   :  { %61 = shalt.err (!%p58_p2)
}
   0x8   :  { %s62_s15 = scalar_lea.vmem %s14_s7, 256  ;;  %p67_p4 = scmp.lt.s32.totalorder %s14_s7, %s14_s7 }
   0x9   :  { %p63_p3 = scmp.ne.s32.totalorder %s14_s7, %s62_s15  ;;  %p68_p5 = scmp.lt.s32.totalorder %s62_s15, %s62_s15 }
   0xb   :  { %p69_p6 = por %p68_p5, %p67_p4 }
   0xd   :  { %p70_p7 = pnand %p69_p6, %p63_p3 }
   0xf   :  { %73 = shalt.err (!%p70_p7)
}
  0x10   :  { %s101_s16 = smov 128   ;;  %s102_s17 = smov 8  }
  0x11   :  { %19 = dma.hbm_to_vmem [thread:$0]  %s138_s0, 256, %s14_s7, [#allocation3], %s101_s16, %s101_s16, %s102_s17  }
  0x12   :  { %96 = dma.done.wait [#allocation3], 256  }
  0x13   :  { %97 = vsyncadd [#allocation3], 4294967040  ;;  %v23_v0 = vld [vmem:[#allocation2] sm:$0xff]  ;;  %v25_v1 = vld [vmem:[#allocation2 + $0x8] sm:$0xff]  ;;  %s103_s20 = smov [#allocation5]  }
  0x14   :  { %s36_s21 = sshll.u32 %s103_s20, 4  ;;  %v26_v2 = vadd.f32 %v25_v1, %v23_v0  ;;  %s37_s21 = int_to_ptr.vmem [resolvable:$true] %s36_s21 }
  0x15   :  { %s74_s22 = scalar_lea.vmem %s37_s21, 256  ;;  %p79_p9 = scmp.lt.s32.totalorder %s37_s21, %s37_s21 }
  0x16   :  { %v27_v3 = vmul.f32 0.5, %v26_v2  ;;  %p75_p8 = scmp.ne.s32.totalorder %s37_s21, %s74_s22  ;;  %p80_p10 = scmp.lt.s32.totalorder %s74_s22, %s74_s22 }
  0x18   :  { %28 = vst [vmem:[#allocation5] sm:$0xff] %v27_v3  ;;  %30 = vst [vmem:[#allocation5 + $0x8] sm:$0xff] %v27_v3  ;;  %p81_p11 = por %p80_p10, %p79_p9 }
  0x1a   :  { %p82_p12 = pnand %p81_p11, %p75_p8 }
  0x1c   :  { %85 = shalt.err (!%p82_p12)
}
  0x1d   :  { %s86_s24 = scalar_lea.hbm %s139_s1, 256 }
  0x1e   :  { %p87_p13 = scmp.ne.s32.totalorder %s139_s1, %s86_s24  ;;  %p90_p0 = scmp.lt.u32.totalorder %s86_s24, %s139_s1 }
  0x20   :  { %p92_p1 = pnand %p90_p0, %p87_p13 }
  0x22   :  { %95 = shalt.err (!%p92_p1)
}
  0x23   :  { %42 = dma.vmem_to_hbm [thread:$0]  %s37_s21, 256, %s139_s1, [#allocation4], %s101_s16, %s101_s16, %s102_s17  }
  0x24   :  { %98 = dma.done.wait [#allocation4], 256  }
  0x25   :  { %99 = vsyncadd [#allocation4], 4294967040 }
  0x26   :  { %46 = vsyncpa [#allocation3], 1 }
  0x27   :  { %47 = vsyncpa [#allocation4], 1 }

</bundles_post_ra>
